<compile_context>
chip_gen: v6e
topology: v6e:2x2x1
jax: 0.10.0
libtpu: 0.0.40
codegen_flags: <defaults>
</compile_context>

<pallas_src>
import math

import jax
import jax.numpy as jnp
from jax.experimental import pallas as pl
from jax.experimental.pallas import tpu as pltpu

HID = 32                       # GRU hidden size

# (block name, contraction rows stored) -- rows rounded up to 32 so every
# static slice offset is bf16-tile aligned.
_BLOCKS = (("FC1", 32), ("FC2", 128),
           ("G1L0_IH", 128), ("G1L0_HH", 32), ("G1L1", 64),
           ("FC3", 32), ("FC4", 32), ("FC5", 32),
           ("G2L0_IH", 128), ("G2L0_HH", 32), ("G2L1", 64),
           ("FC6", 32), ("HEAD", 32))
ROWS = dict(_BLOCKS)
OFFSETS = {}
_off = 0
for _name, _r in _BLOCKS:
    OFFSETS[_name] = _off
    _off += _r
W_ROWS = _off                   # 768
BIAS_IDX = {name: i for i, (name, _) in enumerate(_BLOCKS)}
BIAS_ROWS = 16                  # 13 used, padded to 16 (f32 sublane tile)


# ---------------------------------------------------------------------------
# Kernel
# ---------------------------------------------------------------------------
def dqn_kernel(w_ref, b_ref, x_ref, h0_ref, out_ref, h_ref):
    t = pl.program_id(0)

    @pl.when(t == 0)
    def _init():
        h_ref[...] = h0_ref[...]          # seed the resident hidden-state block

    biases = b_ref[...]                                        # (16,128) f32
    zeros96 = jnp.zeros((1, 128 - HID), jnp.float32)           # hoisted pad
    zeros4x128 = jnp.zeros((4, 128), jnp.float32)
    lane = jax.lax.broadcasted_iota(jnp.int32, (1, 128), 1)    # hoisted iota

    def dense(name, x):
        # x: (1, rows) f32 -> bf16 LHS; weight block: (rows, 128) bf16.
        rows, off, bi = ROWS[name], OFFSETS[name], BIAS_IDX[name]
        assert x.shape == (1, rows)
        w = w_ref[off:off + rows, :]
        return (jnp.dot(x.astype(jnp.bfloat16), w,
                        preferred_element_type=jnp.float32)
                + biases[bi:bi + 1, :])

    def pad128(v):                                             # (1,HID)->(1,128)
        return jnp.concatenate([v, zeros96], axis=1)

    def gru_l0(ih, hh, x_full, h):
        # Layer-0 GRU cell: separate ih (K=128) and hh (K=32) pushes,
        # gate lanes (r, z, n) in columns 0..95.
        gi = dense(ih, x_full)
        gh = dense(hh, h)
        s = jax.nn.sigmoid(gi[:, 0:2 * HID] + gh[:, 0:2 * HID])
        r, z = s[:, 0:HID], s[:, HID:2 * HID]
        n = jnp.tanh(gi[:, 2 * HID:3 * HID] + r * gh[:, 2 * HID:3 * HID])
        return (1.0 - z) * n + z * h                           # (1,HID)

    def gru_l1(slot, x, h):
        # Layer-1 GRU cell fused into ONE (1,64)x(64,128) push.
        # Output lanes: 0..63 = (gi+gh) for r|z (combined bias),
        #               64..95 = gi_n (+bih_n), 96..127 = gh_n (+bhh_n).
        g = dense(slot, jnp.concatenate([x, h], axis=1))
        s = jax.nn.sigmoid(g[:, 0:2 * HID])
        r, z = s[:, 0:HID], s[:, HID:2 * HID]
        n = jnp.tanh(g[:, 2 * HID:3 * HID] + r * g[:, 3 * HID:4 * HID])
        return (1.0 - z) * n + z * h

    h_in = h_ref[...]                                          # (8,128) f32
    h1l0, h1l1 = h_in[0:1, 0:HID], h_in[1:2, 0:HID]
    h2l0, h2l1 = h_in[2:3, 0:HID], h_in[3:4, 0:HID]

    x = x_ref[0]                                               # (1,128), 7 real lanes
    x = jax.nn.sigmoid(dense("FC1", x[:, 0:32]))               # fcl1
    x = jnp.tanh(dense("FC2", x))                              # fcl2

    h1l0 = gru_l0("G1L0_IH", "G1L0_HH", x, h1l0)               # rnn1 layer 0
    h1l1 = gru_l1("G1L1", h1l0, h1l1)                          # rnn1 layer 1

    x = jnp.maximum(dense("FC3", h1l1), 0.0)                   # fcl3 + relu
    # lanes 5..31 of the FC5 LHS are sigmoid(0)=0.5 but hit zero weight rows.
    x = jax.nn.sigmoid(dense("FC4", x[:, 0:32]))               # fcl4 (5 real lanes)
    x = jnp.tanh(dense("FC5", x[:, 0:32]))                     # fcl5

    h2l0 = gru_l0("G2L0_IH", "G2L0_HH", x, h2l0)               # rnn2 layer 0
    h2l1 = gru_l1("G2L1", h2l0, h2l1)                          # rnn2 layer 1

    x = jnp.maximum(dense("FC6", h2l1), 0.0)                   # fcl6 + relu
    head = dense("HEAD", x[:, 0:32])                           # lanes 0..2 action, 3 value

    # exact softmax over lanes 0..2
    masked = jnp.where(lane < 3, head, -jnp.inf)
    e = jnp.exp(masked - jnp.max(masked, axis=-1, keepdims=True))
    probs = e / jnp.sum(e, axis=-1, keepdims=True)
    out_ref[0] = jnp.where(lane == 3, head, probs)             # lane-dense (1,128)

    # single unmasked full-tile store of the updated hidden state
    h_ref[...] = jnp.concatenate(
        [pad128(h1l0), pad128(h1l1), pad128(h2l0), pad128(h2l1), zeros4x128],
        axis=0)


# ---------------------------------------------------------------------------
# Parameter construction (PyTorch layout) and slab packing
# ---------------------------------------------------------------------------
def make_torch_params(key):
    keys = iter(jax.random.split(key, 64))
    p = {}

    def lin(name, in_f, out_f):
        bound = 1.0 / math.sqrt(in_f)
        p[name + "_w"] = jax.random.uniform(next(keys), (out_f, in_f),
                                            jnp.float32, -bound, bound)
        p[name + "_b"] = jax.random.uniform(next(keys), (out_f,),
                                            jnp.float32, -bound, bound)

    def gru(name, in_f, hid):
        bound = 1.0 / math.sqrt(hid)
        for l in range(2):
            inf = in_f if l == 0 else hid
            p[f"{name}_wih{l}"] = jax.random.uniform(next(keys), (3 * hid, inf),
                                                     jnp.float32, -bound, bound)
            p[f"{name}_whh{l}"] = jax.random.uniform(next(keys), (3 * hid, hid),
                                                     jnp.float32, -bound, bound)
            p[f"{name}_bih{l}"] = jax.random.uniform(next(keys), (3 * hid,),
                                                     jnp.float32, -bound, bound)
            p[f"{name}_bhh{l}"] = jax.random.uniform(next(keys), (3 * hid,),
                                                     jnp.float32, -bound, bound)

    lin("fc1", 7, 128); lin("fc2", 128, 128); lin("fc3", 32, 32)
    lin("fc4", 32, 5); lin("fc5", 5, 128); lin("fc6", 32, 31)
    lin("action", 31, 3); lin("value", 31, 1)
    gru("rnn1", 128, HID); gru("rnn2", 128, HID)
    return p


def pack_params(p):
    """Pack torch-layout params -> (bf16 (W_ROWS,128) weight slab, f32 (16,128) biases)."""
    w = jnp.zeros((W_ROWS, 128), jnp.float32)
    b = jnp.zeros((BIAS_ROWS, 128), jnp.float32)

    def put(w, b, slot, wt, bias):            # wt: (in,out), bias: (out,)
        off = OFFSETS[slot]
        r, c = wt.shape
        w = w.at[off:off + r, :c].set(wt)
        b = b.at[BIAS_IDX[slot], :bias.shape[0]].set(bias)
        return w, b

    for slot, name in (("FC1", "fc1"), ("FC2", "fc2"), ("FC3", "fc3"),
                       ("FC4", "fc4"), ("FC5", "fc5"), ("FC6", "fc6")):
        w, b = put(w, b, slot, p[name + "_w"].T, p[name + "_b"])

    # fused head: columns 0..2 = action scores, column 3 = state value
    w, b = put(w, b, "HEAD",
               jnp.concatenate([p["action_w"].T, p["value_w"].T], axis=1),
               jnp.concatenate([p["action_b"], p["value_b"]], axis=0))

    # GRU layer 0: separate ih / hh blocks, gate columns (r, z, n)
    for rnn, ih, hh in (("rnn1", "G1L0_IH", "G1L0_HH"),
                        ("rnn2", "G2L0_IH", "G2L0_HH")):
        w, b = put(w, b, ih, p[f"{rnn}_wih0"].T, p[f"{rnn}_bih0"])
        w, b = put(w, b, hh, p[f"{rnn}_whh0"].T, p[f"{rnn}_bhh0"])

    # GRU layer 1: fused (64,128) block (see gru_l1 lane map in the kernel)
    for rnn, slot in (("rnn1", "G1L1"), ("rnn2", "G2L1")):
        wih, whh = p[f"{rnn}_wih1"].T, p[f"{rnn}_whh1"].T        # (32,96)
        bih, bhh = p[f"{rnn}_bih1"], p[f"{rnn}_bhh1"]            # (96,)
        off = OFFSETS[slot]
        w = w.at[off:off + 32, 0:64].set(wih[:, 0:64])           # r|z from x
        w = w.at[off + 32:off + 64, 0:64].set(whh[:, 0:64])      # r|z from h
        w = w.at[off:off + 32, 64:96].set(wih[:, 64:96])         # gi_n
        w = w.at[off + 32:off + 64, 96:128].set(whh[:, 64:96])   # gh_n
        bi = BIAS_IDX[slot]
        b = b.at[bi, 0:64].set(bih[0:64] + bhh[0:64])
        b = b.at[bi, 64:96].set(bih[64:96])
        b = b.at[bi, 96:128].set(bhh[64:96])

    return w.astype(jnp.bfloat16), b


# ---------------------------------------------------------------------------
# Wrapper
# ---------------------------------------------------------------------------
@jax.jit
def dqn_forward(w_slab, b_slab, x_seq, h0):
    """w_slab: (768,128) bf16, b_slab: (16,128) f32, x_seq: (T,7), h0: (8,128)
       -> (probs (T,3), values (T,1), new hidden state (8,128))"""
    T = x_seq.shape[0]
    x_pad = jnp.zeros((T, 1, 128), jnp.float32).at[:, 0, :7].set(
        x_seq.astype(jnp.float32))
    out, h_new = pl.pallas_call(
        dqn_kernel,
        out_shape=(jax.ShapeDtypeStruct((T, 1, 128), jnp.float32),
                   jax.ShapeDtypeStruct((8, 128), jnp.float32)),
        grid=(T,),
        in_specs=[
            pl.BlockSpec((W_ROWS, 128), lambda t: (0, 0)),      # resident weights
            pl.BlockSpec((BIAS_ROWS, 128), lambda t: (0, 0)),   # resident biases
            pl.BlockSpec((1, 1, 128), lambda t: (t, 0, 0)),     # per-step input
            pl.BlockSpec((8, 128), lambda t: (0, 0)),           # initial hidden
        ],
        out_specs=(
            pl.BlockSpec((1, 1, 128), lambda t: (t, 0, 0)),     # per-step output
            pl.BlockSpec((8, 128), lambda t: (0, 0)),           # resident hidden carry
        ),
        compiler_params=pltpu.CompilerParams(
            dimension_semantics=("arbitrary",)),                # serial recurrence
    )(w_slab, b_slab, x_pad, h0)
    return out[:, 0, 0:3], out[:, 0, 3:4], h_new


# ---------------------------------------------------------------------------
# Pure-jnp reference (torch layout, independent of the slab packing)
# ---------------------------------------------------------------------------
def _bf(x):
    """Round to bf16 and back (matches the kernel's bf16 MXU operands)."""
    return x.astype(jnp.bfloat16).astype(jnp.float32)


def dqn_reference(p, xs, h0):
    def lin(name, x):
        return _bf(x) @ _bf(p[name + "_w"].T) + p[name + "_b"]

    def gru_cell(rnn, layer, x, h):
        gi = _bf(x) @ _bf(p[f"{rnn}_wih{layer}"].T) + p[f"{rnn}_bih{layer}"]
        gh = _bf(h) @ _bf(p[f"{rnn}_whh{layer}"].T) + p[f"{rnn}_bhh{layer}"]
        r = jax.nn.sigmoid(gi[:, 0:HID] + gh[:, 0:HID])
        z = jax.nn.sigmoid(gi[:, HID:2 * HID] + gh[:, HID:2 * HID])
        n = jnp.tanh(gi[:, 2 * HID:3 * HID] + r * gh[:, 2 * HID:3 * HID])
        return (1.0 - z) * n + z * h

    h = [h0[i:i + 1, 0:HID] for i in range(4)]
    probs, values = [], []
    for t in range(xs.shape[0]):
        x = xs[t:t + 1, :]
        x = jax.nn.sigmoid(lin("fc1", x))
        x = jnp.tanh(lin("fc2", x))
        h[0] = gru_cell("rnn1", 0, x, h[0])
        h[1] = gru_cell("rnn1", 1, h[0], h[1])
        x = jnp.maximum(lin("fc3", h[1]), 0.0)
        x = jax.nn.sigmoid(lin("fc4", x))
        x = jnp.tanh(lin("fc5", x))
        h[2] = gru_cell("rnn2", 0, x, h[2])
        h[3] = gru_cell("rnn2", 1, h[2], h[3])
        x = jnp.maximum(lin("fc6", h[3]), 0.0)
        probs.append(jax.nn.softmax(lin("action", x)[0]))
        values.append(lin("value", x)[0])
    h_new = jnp.zeros((8, 128), jnp.float32)
    for i in range(4):
        h_new = h_new.at[i, 0:HID].set(h[i][0])
    return jnp.stack(probs), jnp.stack(values), h_new


# ---------------------------------------------------------------------------
if __name__ == "__main__":
    key = jax.random.PRNGKey(0)
    pkey, xkey = jax.random.split(key)
    torch_params = make_torch_params(pkey)
    w_slab, b_slab = pack_params(torch_params)

    T = 8
    xs = jax.random.normal(xkey, (T, 7), jnp.float32)
    h0 = jnp.zeros((8, 128), jnp.float32)   # rows 0..3 = [h1_l0, h1_l1, h2_l0, h2_l1]

    # Two chained dispatches: tests both the in-grid recurrence and the
    # cross-dispatch hidden-state threading.
    p_a, v_a, h_mid = dqn_forward(w_slab, b_slab, xs[:5], h0)
    p_b, v_b, h_end = dqn_forward(w_slab, b_slab, xs[5:], h_mid)
    probs = jnp.concatenate([p_a, p_b], axis=0)
    values = jnp.concatenate([v_a, v_b], axis=0)
    jax.block_until_ready((probs, values, h_end))

    ref_probs, ref_values, ref_h = dqn_reference(torch_params, xs, h0)

    assert probs.shape == (T, 3) and values.shape == (T, 1) and h_end.shape == (8, 128)
    assert bool(jnp.allclose(jnp.sum(probs, axis=-1), 1.0, atol=1e-5))
    assert bool(jnp.allclose(probs, ref_probs, atol=2e-3)), \
        float(jnp.abs(probs - ref_probs).max())
    assert bool(jnp.allclose(values, ref_values, atol=2e-3)), \
        float(jnp.abs(values - ref_values).max())
    assert bool(jnp.allclose(h_end, ref_h, atol=2e-3)), \
        float(jnp.abs(h_end - ref_h).max())
    print("KERNEL_OK")
</pallas_src>

<mosaic_0001>
module attributes {stable_mosaic.version = 11 : i64} {
  func.func @dqn_kernel(%arg0: i32, %arg1: memref<768x128xbf16, #tpu.memory_space<vmem>>, %arg2: memref<16x128xf32, #tpu.memory_space<vmem>>, %arg3: memref<1x1x128xf32, #tpu.memory_space<vmem>>, %arg4: memref<8x128xf32, #tpu.memory_space<vmem>>, %arg5: memref<1x1x128xf32, #tpu.memory_space<vmem>>, %arg6: memref<8x128xf32, #tpu.memory_space<vmem>>) attributes {dimension_semantics = [#tpu.dimension_semantics<arbitrary>], iteration_bounds = array<i64: 5>, scalar_prefetch = 0 : i64, scratch_operands = 0 : i64, tpu.core_type = #tpu.core_type<tc>, window_params = [{pipeline_mode = #tpu.pipeline_mode<synchronous>, transform_indices = @transform_0, window_bounds = array<i64: 768, 128>}, {pipeline_mode = #tpu.pipeline_mode<synchronous>, transform_indices = @transform_1, window_bounds = array<i64: 16, 128>}, {transform_indices = @transform_2, window_bounds = array<i64: 1, 1, 128>}, {pipeline_mode = #tpu.pipeline_mode<synchronous>, transform_indices = @transform_3, window_bounds = array<i64: 8, 128>}, {transform_indices = @transform_4, window_bounds = array<i64: 1, 1, 128>}, {pipeline_mode = #tpu.pipeline_mode<synchronous>, transform_indices = @transform_5, window_bounds = array<i64: 8, 128>}]} {
    %c0_i32 = arith.constant 0 : i32
    %0 = arith.cmpi eq, %arg0, %c0_i32 : i32
    %1 = arith.extui %0 : i1 to i32
    %c0_i32_0 = arith.constant 0 : i32
    %2 = arith.cmpi ne, %1, %c0_i32_0 : i32
    scf.if %2 {
      %c0_56 = arith.constant 0 : index
      %c0_57 = arith.constant 0 : index
      %202 = vector.load %arg4[%c0_56, %c0_57] : memref<8x128xf32, #tpu.memory_space<vmem>>, vector<8x128xf32>
      %c0_58 = arith.constant 0 : index
      %c0_59 = arith.constant 0 : index
      %203 = vector.load %arg6[%c0_58, %c0_59] : memref<8x128xf32, #tpu.memory_space<vmem>>, vector<8x128xf32>
      tpu.vector_store %arg6[%c0_58, %c0_59], %202 {strides = array<i32>} : memref<8x128xf32, #tpu.memory_space<vmem>>, vector<8x128xf32>,
    } else {
    }
    %c0 = arith.constant 0 : index
    %c0_1 = arith.constant 0 : index
    %3 = vector.load %arg2[%c0, %c0_1] : memref<16x128xf32, #tpu.memory_space<vmem>>, vector<16x128xf32>
    %cst = arith.constant 0.000000e+00 : f32
    %4 = vector.broadcast %cst : f32 to vector<1x96xf32>
    %cst_2 = arith.constant 0.000000e+00 : f32
    %5 = vector.broadcast %cst_2 : f32 to vector<4x128xf32>
    %6 = tpu.iota {dimensions = array<i32: 1>} : vector<1x128xi32>
    %c0_3 = arith.constant 0 : index
    %c0_4 = arith.constant 0 : index
    %7 = vector.load %arg6[%c0_3, %c0_4] : memref<8x128xf32, #tpu.memory_space<vmem>>, vector<8x128xf32>
    %8 = vector.extract_strided_slice %7 {offsets = [0, 0], sizes = [1, 32], strides = [1, 1]} : vector<8x128xf32> to vector<1x32xf32>
    %9 = vector.extract_strided_slice %7 {offsets = [1, 0], sizes = [1, 32], strides = [1, 1]} : vector<8x128xf32> to vector<1x32xf32>
    %10 = vector.extract_strided_slice %7 {offsets = [2, 0], sizes = [1, 32], strides = [1, 1]} : vector<8x128xf32> to vector<1x32xf32>
    %11 = vector.extract_strided_slice %7 {offsets = [3, 0], sizes = [1, 32], strides = [1, 1]} : vector<8x128xf32> to vector<1x32xf32>
    %c0_5 = arith.constant 0 : index
    %c0_6 = arith.constant 0 : index
    %c0_7 = arith.constant 0 : index
    %12 = vector.load %arg3[%c0_5, %c0_6, %c0_7] : memref<1x1x128xf32, #tpu.memory_space<vmem>>, vector<1x1x128xf32>
    %13 = vector.shape_cast %12 : vector<1x1x128xf32> to vector<1x128xf32>
    %14 = vector.extract_strided_slice %13 {offsets = [0, 0], sizes = [1, 32], strides = [1, 1]} : vector<1x128xf32> to vector<1x32xf32>
    %c0_8 = arith.constant 0 : index
    %c0_9 = arith.constant 0 : index
    %15 = vector.load %arg1[%c0_8, %c0_9] : memref<768x128xbf16, #tpu.memory_space<vmem>>, vector<32x128xbf16>
    %16 = arith.truncf %14 : vector<1x32xf32> to vector<1x32xbf16>
    %cst_10 = arith.constant dense<0.000000e+00> : vector<1x128xf32>
    %17 = tpu.matmul %16, %15, %cst_10 {dimension_numbers = #tpu.dot_dimension_numbers<[1], [0], [0], [1], [0, 0, 1, 1], [], []>} : vector<1x32xbf16>, vector<32x128xbf16>, vector<1x128xf32> -> vector<1x128xf32>
    %18 = vector.extract_strided_slice %3 {offsets = [0, 0], sizes = [1, 128], strides = [1, 1]} : vector<16x128xf32> to vector<1x128xf32>
    %19 = arith.addf %17, %18 : vector<1x128xf32>
    %20 = arith.negf %19 : vector<1x128xf32>
    %21 = math.exp %20 : vector<1x128xf32>
    %cst_11 = arith.constant 1.000000e+00 : f32
    %22 = vector.broadcast %cst_11 : f32 to vector<1x128xf32>
    %23 = arith.addf %22, %21 : vector<1x128xf32>
    %24 = arith.divf %22, %23 : vector<1x128xf32>
    %c32 = arith.constant 32 : index
    %c0_12 = arith.constant 0 : index
    %25 = vector.load %arg1[%c32, %c0_12] : memref<768x128xbf16, #tpu.memory_space<vmem>>, vector<128x128xbf16>
    %26 = arith.truncf %24 : vector<1x128xf32> to vector<1x128xbf16>
    %cst_13 = arith.constant dense<0.000000e+00> : vector<1x128xf32>
    %27 = tpu.matmul %26, %25, %cst_13 {dimension_numbers = #tpu.dot_dimension_numbers<[1], [0], [0], [1], [0, 0, 1, 1], [], []>} : vector<1x128xbf16>, vector<128x128xbf16>, vector<1x128xf32> -> vector<1x128xf32>
    %28 = vector.extract_strided_slice %3 {offsets = [1, 0], sizes = [1, 128], strides = [1, 1]} : vector<16x128xf32> to vector<1x128xf32>
    %29 = arith.addf %27, %28 : vector<1x128xf32>
    %30 = math.tanh %29 : vector<1x128xf32>
    %c160 = arith.constant 160 : index
    %c0_14 = arith.constant 0 : index
    %31 = vector.load %arg1[%c160, %c0_14] : memref<768x128xbf16, #tpu.memory_space<vmem>>, vector<128x128xbf16>
    %32 = arith.truncf %30 : vector<1x128xf32> to vector<1x128xbf16>
    %cst_15 = arith.constant dense<0.000000e+00> : vector<1x128xf32>
    %33 = tpu.matmul %32, %31, %cst_15 {dimension_numbers = #tpu.dot_dimension_numbers<[1], [0], [0], [1], [0, 0, 1, 1], [], []>} : vector<1x128xbf16>, vector<128x128xbf16>, vector<1x128xf32> -> vector<1x128xf32>
    %34 = vector.extract_strided_slice %3 {offsets = [2, 0], sizes = [1, 128], strides = [1, 1]} : vector<16x128xf32> to vector<1x128xf32>
    %35 = arith.addf %33, %34 : vector<1x128xf32>
    %c288 = arith.constant 288 : index
    %c0_16 = arith.constant 0 : index
    %36 = vector.load %arg1[%c288, %c0_16] : memref<768x128xbf16, #tpu.memory_space<vmem>>, vector<32x128xbf16>
    %37 = arith.truncf %8 : vector<1x32xf32> to vector<1x32xbf16>
    %cst_17 = arith.constant dense<0.000000e+00> : vector<1x128xf32>
    %38 = tpu.matmul %37, %36, %cst_17 {dimension_numbers = #tpu.dot_dimension_numbers<[1], [0], [0], [1], [0, 0, 1, 1], [], []>} : vector<1x32xbf16>, vector<32x128xbf16>, vector<1x128xf32> -> vector<1x128xf32>
    %39 = vector.extract_strided_slice %3 {offsets = [3, 0], sizes = [1, 128], strides = [1, 1]} : vector<16x128xf32> to vector<1x128xf32>
    %40 = arith.addf %38, %39 : vector<1x128xf32>
    %41 = vector.extract_strided_slice %35 {offsets = [0, 0], sizes = [1, 64], strides = [1, 1]} : vector<1x128xf32> to vector<1x64xf32>
    %42 = vector.extract_strided_slice %40 {offsets = [0, 0], sizes = [1, 64], strides = [1, 1]} : vector<1x128xf32> to vector<1x64xf32>
    %43 = arith.addf %41, %42 : vector<1x64xf32>
    %44 = arith.negf %43 : vector<1x64xf32>
    %45 = math.exp %44 : vector<1x64xf32>
    %cst_18 = arith.constant 1.000000e+00 : f32
    %46 = vector.broadcast %cst_18 : f32 to vector<1x64xf32>
    %47 = arith.addf %46, %45 : vector<1x64xf32>
    %48 = arith.divf %46, %47 : vector<1x64xf32>
    %49 = vector.extract_strided_slice %48 {offsets = [0, 0], sizes = [1, 32], strides = [1, 1]} : vector<1x64xf32> to vector<1x32xf32>
    %50 = vector.extract_strided_slice %48 {offsets = [0, 32], sizes = [1, 32], strides = [1, 1]} : vector<1x64xf32> to vector<1x32xf32>
    %51 = vector.extract_strided_slice %35 {offsets = [0, 64], sizes = [1, 32], strides = [1, 1]} : vector<1x128xf32> to vector<1x32xf32>
    %52 = vector.extract_strided_slice %40 {offsets = [0, 64], sizes = [1, 32], strides = [1, 1]} : vector<1x128xf32> to vector<1x32xf32>
    %53 = arith.mulf %49, %52 : vector<1x32xf32>
    %54 = arith.addf %51, %53 : vector<1x32xf32>
    %55 = math.tanh %54 : vector<1x32xf32>
    %cst_19 = arith.constant 1.000000e+00 : f32
    %56 = vector.broadcast %cst_19 : f32 to vector<1x32xf32>
    %57 = arith.subf %56, %50 : vector<1x32xf32>
    %58 = arith.mulf %57, %55 : vector<1x32xf32>
    %59 = arith.mulf %50, %8 : vector<1x32xf32>
    %60 = arith.addf %58, %59 : vector<1x32xf32>
    %61 = tpu.concatenate %60, %9 in 1 : vector<1x32xf32>, vector<1x32xf32> -> vector<1x64xf32>
    %c320 = arith.constant 320 : index
    %c0_20 = arith.constant 0 : index
    %62 = vector.load %arg1[%c320, %c0_20] : memref<768x128xbf16, #tpu.memory_space<vmem>>, vector<64x128xbf16>
    %63 = arith.truncf %61 : vector<1x64xf32> to vector<1x64xbf16>
    %cst_21 = arith.constant dense<0.000000e+00> : vector<1x128xf32>
    %64 = tpu.matmul %63, %62, %cst_21 {dimension_numbers = #tpu.dot_dimension_numbers<[1], [0], [0], [1], [0, 0, 1, 1], [], []>} : vector<1x64xbf16>, vector<64x128xbf16>, vector<1x128xf32> -> vector<1x128xf32>
    %65 = vector.extract_strided_slice %3 {offsets = [4, 0], sizes = [1, 128], strides = [1, 1]} : vector<16x128xf32> to vector<1x128xf32>
    %66 = arith.addf %64, %65 : vector<1x128xf32>
    %67 = vector.extract_strided_slice %66 {offsets = [0, 0], sizes = [1, 64], strides = [1, 1]} : vector<1x128xf32> to vector<1x64xf32>
    %68 = arith.negf %67 : vector<1x64xf32>
    %69 = math.exp %68 : vector<1x64xf32>
    %cst_22 = arith.constant 1.000000e+00 : f32
    %70 = vector.broadcast %cst_22 : f32 to vector<1x64xf32>
    %71 = arith.addf %70, %69 : vector<1x64xf32>
    %72 = arith.divf %70, %71 : vector<1x64xf32>
    %73 = vector.extract_strided_slice %72 {offsets = [0, 0], sizes = [1, 32], strides = [1, 1]} : vector<1x64xf32> to vector<1x32xf32>
    %74 = vector.extract_strided_slice %72 {offsets = [0, 32], sizes = [1, 32], strides = [1, 1]} : vector<1x64xf32> to vector<1x32xf32>
    %75 = vector.extract_strided_slice %66 {offsets = [0, 64], sizes = [1, 32], strides = [1, 1]} : vector<1x128xf32> to vector<1x32xf32>
    %76 = vector.extract_strided_slice %66 {offsets = [0, 96], sizes = [1, 32], strides = [1, 1]} : vector<1x128xf32> to vector<1x32xf32>
    %77 = arith.mulf %73, %76 : vector<1x32xf32>
    %78 = arith.addf %75, %77 : vector<1x32xf32>
    %79 = math.tanh %78 : vector<1x32xf32>
    %cst_23 = arith.constant 1.000000e+00 : f32
    %80 = vector.broadcast %cst_23 : f32 to vector<1x32xf32>
    %81 = arith.subf %80, %74 : vector<1x32xf32>
    %82 = arith.mulf %81, %79 : vector<1x32xf32>
    %83 = arith.mulf %74, %9 : vector<1x32xf32>
    %84 = arith.addf %82, %83 : vector<1x32xf32>
    %c384 = arith.constant 384 : index
    %c0_24 = arith.constant 0 : index
    %85 = vector.load %arg1[%c384, %c0_24] : memref<768x128xbf16, #tpu.memory_space<vmem>>, vector<32x128xbf16>
    %86 = arith.truncf %84 : vector<1x32xf32> to vector<1x32xbf16>
    %cst_25 = arith.constant dense<0.000000e+00> : vector<1x128xf32>
    %87 = tpu.matmul %86, %85, %cst_25 {dimension_numbers = #tpu.dot_dimension_numbers<[1], [0], [0], [1], [0, 0, 1, 1], [], []>} : vector<1x32xbf16>, vector<32x128xbf16>, vector<1x128xf32> -> vector<1x128xf32>
    %88 = vector.extract_strided_slice %3 {offsets = [5, 0], sizes = [1, 128], strides = [1, 1]} : vector<16x128xf32> to vector<1x128xf32>
    %89 = arith.addf %87, %88 : vector<1x128xf32>
    %cst_26 = arith.constant 0.000000e+00 : f32
    %90 = vector.broadcast %cst_26 : f32 to vector<1x128xf32>
    %91 = arith.maximumf %89, %90 : vector<1x128xf32>
    %92 = vector.extract_strided_slice %91 {offsets = [0, 0], sizes = [1, 32], strides = [1, 1]} : vector<1x128xf32> to vector<1x32xf32>
    %c416 = arith.constant 416 : index
    %c0_27 = arith.constant 0 : index
    %93 = vector.load %arg1[%c416, %c0_27] : memref<768x128xbf16, #tpu.memory_space<vmem>>, vector<32x128xbf16>
    %94 = arith.truncf %92 : vector<1x32xf32> to vector<1x32xbf16>
    %cst_28 = arith.constant dense<0.000000e+00> : vector<1x128xf32>
    %95 = tpu.matmul %94, %93, %cst_28 {dimension_numbers = #tpu.dot_dimension_numbers<[1], [0], [0], [1], [0, 0, 1, 1], [], []>} : vector<1x32xbf16>, vector<32x128xbf16>, vector<1x128xf32> -> vector<1x128xf32>
    %96 = vector.extract_strided_slice %3 {offsets = [6, 0], sizes = [1, 128], strides = [1, 1]} : vector<16x128xf32> to vector<1x128xf32>
    %97 = arith.addf %95, %96 : vector<1x128xf32>
    %98 = arith.negf %97 : vector<1x128xf32>
    %99 = math.exp %98 : vector<1x128xf32>
    %cst_29 = arith.constant 1.000000e+00 : f32
    %100 = vector.broadcast %cst_29 : f32 to vector<1x128xf32>
    %101 = arith.addf %100, %99 : vector<1x128xf32>
    %102 = arith.divf %100, %101 : vector<1x128xf32>
    %103 = vector.extract_strided_slice %102 {offsets = [0, 0], sizes = [1, 32], strides = [1, 1]} : vector<1x128xf32> to vector<1x32xf32>
    %c448 = arith.constant 448 : index
    %c0_30 = arith.constant 0 : index
    %104 = vector.load %arg1[%c448, %c0_30] : memref<768x128xbf16, #tpu.memory_space<vmem>>, vector<32x128xbf16>
    %105 = arith.truncf %103 : vector<1x32xf32> to vector<1x32xbf16>
    %cst_31 = arith.constant dense<0.000000e+00> : vector<1x128xf32>
    %106 = tpu.matmul %105, %104, %cst_31 {dimension_numbers = #tpu.dot_dimension_numbers<[1], [0], [0], [1], [0, 0, 1, 1], [], []>} : vector<1x32xbf16>, vector<32x128xbf16>, vector<1x128xf32> -> vector<1x128xf32>
    %107 = vector.extract_strided_slice %3 {offsets = [7, 0], sizes = [1, 128], strides = [1, 1]} : vector<16x128xf32> to vector<1x128xf32>
    %108 = arith.addf %106, %107 : vector<1x128xf32>
    %109 = math.tanh %108 : vector<1x128xf32>
    %c480 = arith.constant 480 : index
    %c0_32 = arith.constant 0 : index
    %110 = vector.load %arg1[%c480, %c0_32] : memref<768x128xbf16, #tpu.memory_space<vmem>>, vector<128x128xbf16>
    %111 = arith.truncf %109 : vector<1x128xf32> to vector<1x128xbf16>
    %cst_33 = arith.constant dense<0.000000e+00> : vector<1x128xf32>
    %112 = tpu.matmul %111, %110, %cst_33 {dimension_numbers = #tpu.dot_dimension_numbers<[1], [0], [0], [1], [0, 0, 1, 1], [], []>} : vector<1x128xbf16>, vector<128x128xbf16>, vector<1x128xf32> -> vector<1x128xf32>
    %113 = vector.extract_strided_slice %3 {offsets = [8, 0], sizes = [1, 128], strides = [1, 1]} : vector<16x128xf32> to vector<1x128xf32>
    %114 = arith.addf %112, %113 : vector<1x128xf32>
    %c608 = arith.constant 608 : index
    %c0_34 = arith.constant 0 : index
    %115 = vector.load %arg1[%c608, %c0_34] : memref<768x128xbf16, #tpu.memory_space<vmem>>, vector<32x128xbf16>
    %116 = arith.truncf %10 : vector<1x32xf32> to vector<1x32xbf16>
    %cst_35 = arith.constant dense<0.000000e+00> : vector<1x128xf32>
    %117 = tpu.matmul %116, %115, %cst_35 {dimension_numbers = #tpu.dot_dimension_numbers<[1], [0], [0], [1], [0, 0, 1, 1], [], []>} : vector<1x32xbf16>, vector<32x128xbf16>, vector<1x128xf32> -> vector<1x128xf32>
    %118 = vector.extract_strided_slice %3 {offsets = [9, 0], sizes = [1, 128], strides = [1, 1]} : vector<16x128xf32> to vector<1x128xf32>
    %119 = arith.addf %117, %118 : vector<1x128xf32>
    %120 = vector.extract_strided_slice %114 {offsets = [0, 0], sizes = [1, 64], strides = [1, 1]} : vector<1x128xf32> to vector<1x64xf32>
    %121 = vector.extract_strided_slice %119 {offsets = [0, 0], sizes = [1, 64], strides = [1, 1]} : vector<1x128xf32> to vector<1x64xf32>
    %122 = arith.addf %120, %121 : vector<1x64xf32>
    %123 = arith.negf %122 : vector<1x64xf32>
    %124 = math.exp %123 : vector<1x64xf32>
    %cst_36 = arith.constant 1.000000e+00 : f32
    %125 = vector.broadcast %cst_36 : f32 to vector<1x64xf32>
    %126 = arith.addf %125, %124 : vector<1x64xf32>
    %127 = arith.divf %125, %126 : vector<1x64xf32>
    %128 = vector.extract_strided_slice %127 {offsets = [0, 0], sizes = [1, 32], strides = [1, 1]} : vector<1x64xf32> to vector<1x32xf32>
    %129 = vector.extract_strided_slice %127 {offsets = [0, 32], sizes = [1, 32], strides = [1, 1]} : vector<1x64xf32> to vector<1x32xf32>
    %130 = vector.extract_strided_slice %114 {offsets = [0, 64], sizes = [1, 32], strides = [1, 1]} : vector<1x128xf32> to vector<1x32xf32>
    %131 = vector.extract_strided_slice %119 {offsets = [0, 64], sizes = [1, 32], strides = [1, 1]} : vector<1x128xf32> to vector<1x32xf32>
    %132 = arith.mulf %128, %131 : vector<1x32xf32>
    %133 = arith.addf %130, %132 : vector<1x32xf32>
    %134 = math.tanh %133 : vector<1x32xf32>
    %cst_37 = arith.constant 1.000000e+00 : f32
    %135 = vector.broadcast %cst_37 : f32 to vector<1x32xf32>
    %136 = arith.subf %135, %129 : vector<1x32xf32>
    %137 = arith.mulf %136, %134 : vector<1x32xf32>
    %138 = arith.mulf %129, %10 : vector<1x32xf32>
    %139 = arith.addf %137, %138 : vector<1x32xf32>
    %140 = tpu.concatenate %139, %11 in 1 : vector<1x32xf32>, vector<1x32xf32> -> vector<1x64xf32>
    %c640 = arith.constant 640 : index
    %c0_38 = arith.constant 0 : index
    %141 = vector.load %arg1[%c640, %c0_38] : memref<768x128xbf16, #tpu.memory_space<vmem>>, vector<64x128xbf16>
    %142 = arith.truncf %140 : vector<1x64xf32> to vector<1x64xbf16>
    %cst_39 = arith.constant dense<0.000000e+00> : vector<1x128xf32>
    %143 = tpu.matmul %142, %141, %cst_39 {dimension_numbers = #tpu.dot_dimension_numbers<[1], [0], [0], [1], [0, 0, 1, 1], [], []>} : vector<1x64xbf16>, vector<64x128xbf16>, vector<1x128xf32> -> vector<1x128xf32>
    %144 = vector.extract_strided_slice %3 {offsets = [10, 0], sizes = [1, 128], strides = [1, 1]} : vector<16x128xf32> to vector<1x128xf32>
    %145 = arith.addf %143, %144 : vector<1x128xf32>
    %146 = vector.extract_strided_slice %145 {offsets = [0, 0], sizes = [1, 64], strides = [1, 1]} : vector<1x128xf32> to vector<1x64xf32>
    %147 = arith.negf %146 : vector<1x64xf32>
    %148 = math.exp %147 : vector<1x64xf32>
    %cst_40 = arith.constant 1.000000e+00 : f32
    %149 = vector.broadcast %cst_40 : f32 to vector<1x64xf32>
    %150 = arith.addf %149, %148 : vector<1x64xf32>
    %151 = arith.divf %149, %150 : vector<1x64xf32>
    %152 = vector.extract_strided_slice %151 {offsets = [0, 0], sizes = [1, 32], strides = [1, 1]} : vector<1x64xf32> to vector<1x32xf32>
    %153 = vector.extract_strided_slice %151 {offsets = [0, 32], sizes = [1, 32], strides = [1, 1]} : vector<1x64xf32> to vector<1x32xf32>
    %154 = vector.extract_strided_slice %145 {offsets = [0, 64], sizes = [1, 32], strides = [1, 1]} : vector<1x128xf32> to vector<1x32xf32>
    %155 = vector.extract_strided_slice %145 {offsets = [0, 96], sizes = [1, 32], strides = [1, 1]} : vector<1x128xf32> to vector<1x32xf32>
    %156 = arith.mulf %152, %155 : vector<1x32xf32>
    %157 = arith.addf %154, %156 : vector<1x32xf32>
    %158 = math.tanh %157 : vector<1x32xf32>
    %cst_41 = arith.constant 1.000000e+00 : f32
    %159 = vector.broadcast %cst_41 : f32 to vector<1x32xf32>
    %160 = arith.subf %159, %153 : vector<1x32xf32>
    %161 = arith.mulf %160, %158 : vector<1x32xf32>
    %162 = arith.mulf %153, %11 : vector<1x32xf32>
    %163 = arith.addf %161, %162 : vector<1x32xf32>
    %c704 = arith.constant 704 : index
    %c0_42 = arith.constant 0 : index
    %164 = vector.load %arg1[%c704, %c0_42] : memref<768x128xbf16, #tpu.memory_space<vmem>>, vector<32x128xbf16>
    %165 = arith.truncf %163 : vector<1x32xf32> to vector<1x32xbf16>
    %cst_43 = arith.constant dense<0.000000e+00> : vector<1x128xf32>
    %166 = tpu.matmul %165, %164, %cst_43 {dimension_numbers = #tpu.dot_dimension_numbers<[1], [0], [0], [1], [0, 0, 1, 1], [], []>} : vector<1x32xbf16>, vector<32x128xbf16>, vector<1x128xf32> -> vector<1x128xf32>
    %167 = vector.extract_strided_slice %3 {offsets = [11, 0], sizes = [1, 128], strides = [1, 1]} : vector<16x128xf32> to vector<1x128xf32>
    %168 = arith.addf %166, %167 : vector<1x128xf32>
    %cst_44 = arith.constant 0.000000e+00 : f32
    %169 = vector.broadcast %cst_44 : f32 to vector<1x128xf32>
    %170 = arith.maximumf %168, %169 : vector<1x128xf32>
    %171 = vector.extract_strided_slice %170 {offsets = [0, 0], sizes = [1, 32], strides = [1, 1]} : vector<1x128xf32> to vector<1x32xf32>
    %c736 = arith.constant 736 : index
    %c0_45 = arith.constant 0 : index
    %172 = vector.load %arg1[%c736, %c0_45] : memref<768x128xbf16, #tpu.memory_space<vmem>>, vector<32x128xbf16>
    %173 = arith.truncf %171 : vector<1x32xf32> to vector<1x32xbf16>
    %cst_46 = arith.constant dense<0.000000e+00> : vector<1x128xf32>
    %174 = tpu.matmul %173, %172, %cst_46 {dimension_numbers = #tpu.dot_dimension_numbers<[1], [0], [0], [1], [0, 0, 1, 1], [], []>} : vector<1x32xbf16>, vector<32x128xbf16>, vector<1x128xf32> -> vector<1x128xf32>
    %175 = vector.extract_strided_slice %3 {offsets = [12, 0], sizes = [1, 128], strides = [1, 1]} : vector<16x128xf32> to vector<1x128xf32>
    %176 = arith.addf %174, %175 : vector<1x128xf32>
    %c3_i32 = arith.constant 3 : i32
    %177 = vector.broadcast %c3_i32 : i32 to vector<1x128xi32>
    %178 = arith.cmpi slt, %6, %177 : vector<1x128xi32>
    %cst_47 = arith.constant 0xFF800000 : f32
    %179 = vector.broadcast %cst_47 : f32 to vector<1x128xf32>
    %180 = arith.select %178, %176, %179 : vector<1x128xi1>, vector<1x128xf32>
    %cst_48 = arith.constant dense<0xFF800000> : vector<1xf32>
    %181 = vector.multi_reduction <maximumf>, %180, %cst_48 [1] : vector<1x128xf32> to vector<1xf32>
    %182 = vector.shape_cast %181 : vector<1xf32> to vector<1x1xf32>
    %183 = vector.broadcast %182 : vector<1x1xf32> to vector<1x128xf32>
    %184 = arith.subf %180, %183 : vector<1x128xf32>
    %185 = math.exp %184 : vector<1x128xf32>
    %cst_49 = arith.constant dense<0.000000e+00> : vector<1xf32>
    %186 = vector.multi_reduction <add>, %185, %cst_49 [1] : vector<1x128xf32> to vector<1xf32>
    %187 = vector.shape_cast %186 : vector<1xf32> to vector<1x1xf32>
    %188 = vector.broadcast %187 : vector<1x1xf32> to vector<1x128xf32>
    %189 = arith.divf %185, %188 : vector<1x128xf32>
    %c3_i32_50 = arith.constant 3 : i32
    %190 = vector.broadcast %c3_i32_50 : i32 to vector<1x128xi32>
    %191 = arith.cmpi eq, %6, %190 : vector<1x128xi32>
    %192 = arith.select %191, %176, %189 : vector<1x128xi1>, vector<1x128xf32>
    %c0_51 = arith.constant 0 : index
    %c0_52 = arith.constant 0 : index
    %c0_53 = arith.constant 0 : index
    %193 = vector.load %arg5[%c0_51, %c0_52, %c0_53] : memref<1x1x128xf32, #tpu.memory_space<vmem>>, vector<1x1x128xf32>
    %194 = vector.shape_cast %193 : vector<1x1x128xf32> to vector<1x128xf32>
    %195 = vector.shape_cast %192 : vector<1x128xf32> to vector<1x1x128xf32>
    tpu.vector_store %arg5[%c0_51, %c0_52, %c0_53], %195 {strides = array<i32>} : memref<1x1x128xf32, #tpu.memory_space<vmem>>, vector<1x1x128xf32>,
    %196 = tpu.concatenate %60, %4 in 1 : vector<1x32xf32>, vector<1x96xf32> -> vector<1x128xf32>
    %197 = tpu.concatenate %84, %4 in 1 : vector<1x32xf32>, vector<1x96xf32> -> vector<1x128xf32>
    %198 = tpu.concatenate %139, %4 in 1 : vector<1x32xf32>, vector<1x96xf32> -> vector<1x128xf32>
    %199 = tpu.concatenate %163, %4 in 1 : vector<1x32xf32>, vector<1x96xf32> -> vector<1x128xf32>
    %200 = tpu.concatenate %196, %197, %198, %199, %5 in 0 : vector<1x128xf32>, vector<1x128xf32>, vector<1x128xf32>, vector<1x128xf32>, vector<4x128xf32> -> vector<8x128xf32>
    %c0_54 = arith.constant 0 : index
    %c0_55 = arith.constant 0 : index
    %201 = vector.load %arg6[%c0_54, %c0_55] : memref<8x128xf32, #tpu.memory_space<vmem>>, vector<8x128xf32>
    tpu.vector_store %arg6[%c0_54, %c0_55], %200 {strides = array<i32>} : memref<8x128xf32, #tpu.memory_space<vmem>>, vector<8x128xf32>,
    return
  }
  func.func @transform_0(%arg0: i32) -> (i32, i32) {
    %c0_i32 = arith.constant 0 : i32
    %c0_i32_0 = arith.constant 0 : i32
    %c0_i32_1 = arith.constant 0 : i32
    return %c0_i32, %c0_i32_0 : i32, i32
  }
  func.func @transform_1(%arg0: i32) -> (i32, i32) {
    %c0_i32 = arith.constant 0 : i32
    %c0_i32_0 = arith.constant 0 : i32
    %c0_i32_1 = arith.constant 0 : i32
    return %c0_i32, %c0_i32_0 : i32, i32
  }
  func.func @transform_2(%arg0: i32) -> (i32, i32, i32) {
    %c0_i32 = arith.constant 0 : i32
    %c0_i32_0 = arith.constant 0 : i32
    %c0_i32_1 = arith.constant 0 : i32
    return %arg0, %c0_i32, %c0_i32_0 : i32, i32, i32
  }
  func.func @transform_3(%arg0: i32) -> (i32, i32) {
    %c0_i32 = arith.constant 0 : i32
    %c0_i32_0 = arith.constant 0 : i32
    %c0_i32_1 = arith.constant 0 : i32
    return %c0_i32, %c0_i32_0 : i32, i32
  }
  func.func @transform_4(%arg0: i32) -> (i32, i32, i32) {
    %c0_i32 = arith.constant 0 : i32
    %c0_i32_0 = arith.constant 0 : i32
    %c0_i32_1 = arith.constant 0 : i32
    return %arg0, %c0_i32, %c0_i32_0 : i32, i32, i32
  }
  func.func @transform_5(%arg0: i32) -> (i32, i32) {
    %c0_i32 = arith.constant 0 : i32
    %c0_i32_0 = arith.constant 0 : i32
    %c0_i32_1 = arith.constant 0 : i32
    return %c0_i32, %c0_i32_0 : i32, i32
  }
}

</mosaic_0001>

<bundles_post_ra>
// kernel: dqn_forward.1
= control target key start
LH: loop header
LB: loop body
LE: loop exit
PB: predicated region body
PF: predicated region fallthrough
CT: control target
= control target key end

     0   :  { %11 = vsyncpa [#allocation3], 0  ;;  %s2232_s0 = inlined_call_operand.hbm [shape: bf16[768,128], index: 0, kind: input, shape index: {}]   ;;  %s2233_s1 = inlined_call_operand.vmem [shape: f32[16,128], index: 1, kind: input, shape index: {}]   ;;  %s2234_s2 = inlined_call_operand.vmem [shape: f32[5,1,128], index: 2, kind: input, shape index: {}]   ;;  %s2235_s3 = inlined_call_operand.vmem [shape: f32[8,128], index: 3, kind: input, shape index: {}]   ;;  %s2236_s4 = inlined_call_operand.vmem [shape: f32[5,1,128], index: 4, kind: output, shape index: {0}]   ;;  %s2237_s5 = inlined_call_operand.hbm [shape: f32[8,128], index: 5, kind: output, shape index: {1}]  }
   0x1   :  { %12 = vsyncpa [#allocation4], 0  ;;  %s2003_s18 = smov 0  }
   0x2 LB: > { %s2009_s19 = sadd.s32 4294967295, %s1962_s18   ;;  %p1494_p0 = scmp.ge.s32.totalorder %s1962_s18, 1  ;;  %s1962_s18 = sphi %s2003_s18, %s18_s18  }
   0x3   : > { %p159_p1 = scmp.lt.s32.totalorder %s1962_s18, 6  ;;  %s1964_s20 = smov [#allocation2]  }
   0x4   : > { %s171_s21 = sshll.u32 %s1964_s20, 4  ;;  %p1789_p4 = scmp.eq.s32.totalorder %s2009_s19, 0  ;;  %s172_s21 = int_to_ptr.vmem [resolvable:$true] %s171_s21 }
   0x5   : > { %p2014_p3 = pnand %p1494_p0, %p159_p1  ;;  %s1909_s23 = scalar_lea.vmem %s172_s21, 6144 }
   0x6   : > { %p1910_p8 = scmp.ne.s32.totalorder %s172_s21, %s1909_s23  ;;  %p1917_p11 = scmp.lt.s32.totalorder %s172_s21, %s172_s21 }
   0x7   : > { %p1785_p5 = pneg %p2014_p3  ;;  %p1918_p12 = scmp.lt.s32.totalorder %s1909_s23, %s1909_s23 }
   0x9   : > { %p1786_p6 = pnand %p1789_p4, %p1785_p5  ;;  %p1919_p13 = por %p1918_p12, %p1917_p11 }
   0xb   : > { %p1900_p7 = pneg %p1786_p6 }
   0xd   : > { %p1912_p9 = pnand %p1910_p8, %p1900_p7 }
   0xf   : > { %p1913_p10 = pneg %p1912_p9 }
  0x11   : > { %p1920_p2 = pnand %p1919_p13, %p1913_p10 }
  0x13   : > { %1923 = shalt.err (!%p1920_p2)
}
  0x14   : > { %s1965_s24 = smov 64   ;;  %s1966_s25 = smov 4  }
  0x15   : > { %1788 = dma.hbm_to_vmem [thread:$0]  (!%p1786_p6), %s2232_s0, 6144, %s172_s21, [#allocation3], %s1965_s24, %s1965_s24, %s1966_s25  }
  0x16   : > { %199 = sbr.rel (%p2014_p3) target bundleno = 4397 (0x112d), region = 36 }
  0x1b   : > { %1953 = dma.done.wait (%p1789_p4), [#allocation3], 6144  }
  0x1c   : > { %1955 = vsyncadd (%p1789_p4), [#allocation3], 4294961152  ;;  %p223_p0 = scmp.lt.s32.totalorder %s2009_s19, 4  ;;  %p2239_p1 = scmp.ne.s32.totalorder %s2009_s19, 0 }
  0x1e   : > { %s2034_s28 = scalar_select %p223_p0, %s2009_s19, 4 }
  0x1f   : > { %233 = sbr.rel (%p2239_p1) target bundleno = 38 (0x26), region = 44 }
  0x20   : > { %s225_s6 = scalar_lea.vmem %s2234_s2, %s2034_s28  ;;  %s228_s9 = scalar_lea.vmem %s2236_s4, %s2034_s28 }
  0x24   : > { %v234_v0 = vld [vmem:[%s2235_s3] sm:$0xff] }
  0x25   : > { %235 = vst [vmem:[#allocation5] sm:$0xff] %v234_v0 }
  0x26 PF: > { %v1810_v1 = vld [vmem:[#allocation2 + $0x8] sm:$0xff]   ;;  %v1967_v2 = vmov 0.0   ;;  %v1811_v3 = vld [vmem:[#allocation2] sm:$0xff]   ;;  %vm1968_vm0 = vmmov 0   ;;  %vm259_vm1 = vcmask 261120   ;;  %v1814_v8 = vld [vmem:[#allocation2 + $0x38] sm:$0xff]  }
  0x27   : > { %1629 = vmatprep.subr.bf16.mxu0 %v1967_v2  ;;  %1637 = vmatprep.subr.bf16.mxu1 %v1967_v2  ;;  %v241_v4 = vld [vmem:[%s225_s6] sm:$0x1]  ;;  %v1812_v6 = vld [vmem:[#allocation2 + $0x48] sm:$0xff]   ;;  %v1815_v9 = vld [vmem:[#allocation2 + $0x30] sm:$0xff]   ;;  %s1969_s14 = smov 64   ;;  %s1970_s15 = smov 96  }
  0x28   : > { %1630 = vmatpush3.bf16.msra.mxu0 %v1810_v1  ;;  %1633 = vmatprep.mubr.msk.bf16.mxu0 %vm1968_vm0, %v1967_v2  ;;  %v246_v5 = vpack.c.bf16 %v241_v4, %v241_v4  ;;  %v1813_v7 = vld [vmem:[#allocation2 + $0x40] sm:$0xff]   ;;  %v1816_v10 = vld [vmem:[#allocation2 + $0x28] sm:$0xff]   ;;  %v1818_v12 = vld [vmem:[#allocation2 + $0x18] sm:$0xff]   ;;  %s1971_s16 = smov 32   ;;  %vm661_vm2 = vcmask 523264   ;;  %vm1368_vm4 = vcmask 1040384  }
  0x29   : > { %1631 = vmatprep.subr.bf16.mxu0 %v1967_v2  ;;  %1653 = vmatprep.mubr.msk.bf16.mxu1 %vm1968_vm0, %v1967_v2  ;;  %v1817_v11 = vld [vmem:[#allocation2 + $0x20] sm:$0xff]   ;;  %v1819_v13 = vld [vmem:[#allocation2 + $0x10] sm:$0xff]   ;;  %v1822_v14 = vld [vmem:[#allocation2 + $0x88] sm:$0xff]   ;;  %vm1405_vm5 = vcmask 1041408   ;;  %vm1407_vm6 = vcmask 1042432   ;;  %s1972_s21 = smov [#allocation5]  }
  0x2a   : > { %1638 = vmatpush3.bf16.msra.mxu1 %v1812_v6  ;;  %v1823_v15 = vld [vmem:[#allocation2 + $0x80] sm:$0xff]   ;;  %v1824_v16 = vld [vmem:[#allocation2 + $0x78] sm:$0xff]   ;;  %v1821_v29 = vld [vmem:[#allocation2 + $0x90] sm:$0xff]   ;;  %s1425_s22 = sshll.u32 %s1972_s21, 4  ;;  %vm1409_vm7 = vcmask 1043456   ;;  %p1791_p2 = scmp.eq.s32.totalorder %s2009_s19, 4  ;;  %s1426_s22 = int_to_ptr.vmem [resolvable:$true] %s1425_s22 }
  0x2b   : > { %1639 = vmatprep.subr.bf16.mxu1 %v1967_v2  ;;  %v2074_v17 = vld [vmem:[%s2233_s1] sm:$0xff]  ;;  %v1820_v27 = vld [vmem:[#allocation2 + $0x98] sm:$0xff]   ;;  %v1825_v32 = vld [vmem:[#allocation2 + $0x70] sm:$0xff]   ;;  %s1924_s23 = scalar_lea.vmem %s1426_s22, 128  ;;  %p1931_p6 = scmp.lt.s32.totalorder %s1426_s22, %s1426_s22 }
  0x2c   : > { %1632 = vmatpush3.bf16.msra.mxu0 %v1811_v3  ;;  %v2079_v30 = vld [vmem:[#allocation5] sm:$0xff]  ;;  %v1826_v33 = vld [vmem:[#allocation2 + $0x68] sm:$0xff]   ;;  %v1828_v35 = vld [vmem:[#allocation2 + $0x58] sm:$0xff]   ;;  %v375_v37 = vrot.slane %v2074_v17, 1  ;;  %v542_v42 = vrot.slane %v2074_v17, 3  ;;  %v483_v51 = vrot.slane %v2074_v17, 2  ;;  %p1925_p3 = scmp.ne.s32.totalorder %s1426_s22, %s1924_s23  ;;  %p1932_p7 = scmp.lt.s32.totalorder %s1924_s23, %s1924_s23 }
  0x2d   : > { %1657 = vmatprep.subr.bf16.mxu0 %v1967_v2  ;;  %v2084_v31 = vpack.c.bf16 %v2079_v30, %v2079_v30  ;;  %v1827_v34 = vld [vmem:[#allocation2 + $0x60] sm:$0xff]   ;;  %v1829_v36 = vld [vmem:[#allocation2 + $0x50] sm:$0xff]   ;;  %v1830_v3 = vld [vmem:[#allocation2 + $0xb8] sm:$0xff]  }
  0x2e   : > { %1640 = vmatpush3.bf16.msra.mxu1 %v1813_v7  ;;  %v1831_v4 = vld [vmem:[#allocation2 + $0xb0] sm:$0xff]   ;;  %v1832_v6 = vld [vmem:[#allocation2 + $0xa8] sm:$0xff]   ;;  %v621_v7 = vrot.slane %v2079_v30, 1  ;;  %p1926_p4 = pnand %p1925_p3, %p1791_p2  ;;  %p1933_p8 = por %p1932_p7, %p1931_p6 }
  0x2f   : > { %1634 = vmatmul.mubr.msk.bf16.vlgmr.msra.gmra.mxu0 %vm259_vm1, %v246_v5  ;;  %1641 = vmatprep.subr.bf16.mxu1 %v1967_v2 }
  0x30   : > { %1673 = vmatprep.mubr.msk.bf16.mxu0 %vm1968_vm0, %v1967_v2  ;;  %1658 = vmatpush3.bf16.msra.mxu0 %v1822_v14  ;;  %p1927_p5 = pneg %p1926_p4 }
  0x31   : > { %1659 = vmatprep.subr.bf16.mxu0 %v1967_v2 }
  0x32   : > { %1642 = vmatpush3.bf16.msra.mxu1 %v1814_v8  ;;  %v1833_v8 = vld [vmem:[#allocation2 + $0xa0] sm:$0xff]   ;;  %p1934_p9 = pnand %p1933_p8, %p1927_p5 }
  0x33   : > { %1643 = vmatprep.subr.bf16.mxu1 %v1967_v2 }
  0x34   : > { %1660 = vmatpush3.bf16.msra.mxu0 %v1823_v15 }
  0x35   : > { %1661 = vmatprep.subr.bf16.mxu0 %v1967_v2 }
  0x36   : > { %1644 = vmatpush3.bf16.msra.mxu1 %v1815_v9 }
  0x37   : > { %1645 = vmatprep.subr.bf16.mxu1 %v1967_v2 }
  0x38   : > { %1662 = vmatpush3.bf16.msra.mxu0 %v1824_v16 }
  0x39   : > { %1663 = vmatprep.subr.bf16.mxu0 %v1967_v2 }
  0x3a   : > { %1646 = vmatpush3.bf16.msra.mxu1 %v1816_v10 }
  0x3b   : > { %1647 = vmatprep.subr.bf16.mxu1 %v1967_v2 }
  0x3c   : > { %1664 = vmatpush3.bf16.msra.mxu0 %v1825_v32 }
  0x3d   : > { %1665 = vmatprep.subr.bf16.mxu0 %v1967_v2 }
  0x3e   : > { %1648 = vmatpush3.bf16.msra.mxu1 %v1817_v11 }
  0x3f   : > { %1649 = vmatprep.subr.bf16.mxu1 %v1967_v2 }
  0x40   : > { %1666 = vmatpush3.bf16.msra.mxu0 %v1826_v33 }
  0x41   : > { %1667 = vmatprep.subr.bf16.mxu0 %v1967_v2 }
  0x42   : > { %1650 = vmatpush3.bf16.msra.mxu1 %v1818_v12 }
  0x43   : > { %1651 = vmatprep.subr.bf16.mxu1 %v1967_v2 }
  0x44   : > { %1668 = vmatpush3.bf16.msra.mxu0 %v1827_v34 }
  0x45   : > { %1669 = vmatprep.subr.bf16.mxu0 %v1967_v2 }
  0x46   : > { %1652 = vmatpush3.bf16.msra.mxu1 %v1819_v13 }
  0x47   : > { %1677 = vmatprep.subr.bf16.mxu1 %v1967_v2 }
  0x48   : > { %1670 = vmatpush3.bf16.msra.mxu0 %v1828_v35 }
  0x49   : > { %1671 = vmatprep.subr.bf16.mxu0 %v1967_v2 }
  0x4c   : > { %1672 = vmatpush3.bf16.msra.mxu0 %v1829_v36  ;;  %v1834_v36 = vld [vmem:[#allocation2 + $0xc8] sm:$0xff]  }
  0x4d   : > { %1685 = vmatprep.subr.bf16.mxu0 %v1967_v2 }
  0xef   : > { %v297_v18 = vpop.f32.mrf.mxu0 }
  0xf0   : > { %v298_v19 = vadd.f32 %v297_v18, %v2074_v17 }
  0xf1   : > { %v1635_v20 = vpop.f32.mrf.mxu0 }
  0xf2   : > { %v1503_v21 = vmul.f32 -1.442695, %v298_v19  ;;  %v659_v20 = vrot.slane %v2074_v17, 4 }
  0xf3   : > { %v300_v22 = vpop.f32.mrf.mxu0 }
  0xf4   : > { %1858 = vpow2.f32 %v1503_v21 }
  0xf5   : > { %v1636_v23 = vpop.f32.mrf.mxu0 }
 0x101   : > { %v1859_v24 = vpop.eup %1858 }
 0x102   : > { %v306_v25 = vadd.f32 1.0, %v1859_v24 }
 0x104   : > { %1860 = vrcp.f32 %v306_v25 }
 0x111   : > { %v1861_v26 = vpop.eup %1860 }
 0x112   : > { %v325_v28 = vpack.c.bf16 %v1861_v26, %v1861_v26 }
 0x114   : > { %1654 = vmatmul.mubr.bf16.vlgmr.msra.gmra.mxu1 %v325_v28 }
 0x115   : > { %1678 = vmatpush3.bf16.msra.mxu1 %v1820_v27  ;;  %1681 = vmatprep.mubr.msk.bf16.mxu1 %vm1968_vm0, %v1967_v2 }
 0x116   : > { %1679 = vmatprep.subr.bf16.mxu1 %v1967_v2 }
 0x119   : > { %1680 = vmatpush3.bf16.msra.mxu1 %v1821_v29 }
 0x11a   : > { %1697 = vmatprep.subr.bf16.mxu1 %v1967_v2 }
 0x11c   : > { %1682 = vmatmul.mubr.msk.bf16.vlgmr.msra.gmra.mxu1 %vm259_vm1, %v2084_v31 }
 0x11d   : > { %1701 = vmatprep.mubr.msk.bf16.mxu1 %vm1968_vm0, %v1967_v2  ;;  %1698 = vmatpush3.bf16.msra.mxu1 %v1834_v36 }
 0x11e   : > { %1699 = vmatprep.subr.bf16.mxu1 %v1967_v2 }
 0x1d4   : > { %v411_v38 = vpop.f32.mrf.mxu1 }
 0x1d5   : > { %v412_v39 = vadd.f32 %v411_v38, %v375_v37  ;;  %v1835_v37 = vld [vmem:[#allocation2 + $0xc0] sm:$0xff]  }
 0x1d6   : > { %v1655_v40 = vpop.f32.mrf.mxu1  ;;  %1700 = vmatpush3.bf16.msra.mxu1 %v1835_v37 }
 0x1d7   : > { %1862 = vtanh.f32 %v412_v39  ;;  %1705 = vmatprep.subr.bf16.mxu1 %v1967_v2 }
 0x1d8   : > { %v414_v41 = vpop.f32.mrf.mxu1 }
 0x1da   : > { %v1656_v43 = vpop.f32.mrf.mxu1 }
 0x1dc   : > { %v581_v44 = vpop.f32.mrf.mxu1 }
 0x1dd   : > { %v582_v45 = vadd.f32 %v581_v44, %v542_v42 }
 0x1de   : > { %v1683_v46 = vpop.f32.mrf.mxu1 }
 0x1df   : > { %595 = vrot.lane.b32.xlu0 %v582_v45, %s1969_s14 }
 0x1e0   : > { %v584_v47 = vpop.f32.mrf.mxu1 }
 0x1e1   : > { %v1837_v47 = vld [vmem:[#allocation2 + $0xd0] sm:$0xff]  }
 0x1e2   : > { %v1684_v48 = vpop.f32.mrf.mxu1 }
 0x1e3   : > { %v750_v48 = vrot.slane %v2074_v17, 5 }
 0x1e4   : > { %v1863_v49 = vpop.eup %1862 }
 0x1e5   : > { %v434_v50 = vpack.c.bf16 %v1863_v49, %v1863_v49 }
 0x1e7   : > { %1674 = vmatmul.mubr.bf16.vlgmr.msra.gmra.mxu0 %v434_v50 }
 0x1e8   : > { %1693 = vmatprep.mubr.msk.bf16.mxu0 %vm1968_vm0, %v1967_v2  ;;  %1686 = vmatpush3.bf16.msra.mxu0 %v1830_v3 }
 0x1e9   : > { %1687 = vmatprep.subr.bf16.mxu0 %v1967_v2 }
 0x1ec   : > { %1688 = vmatpush3.bf16.msra.mxu0 %v1831_v4 }
 0x1ed   : > { %1689 = vmatprep.subr.bf16.mxu0 %v1967_v2 }
 0x1f0   : > { %1690 = vmatpush3.bf16.msra.mxu0 %v1832_v6 }
 0x1f1   : > { %1691 = vmatprep.subr.bf16.mxu0 %v1967_v2 }
 0x1f4   : > { %1692 = vmatpush3.bf16.msra.mxu0 %v1833_v8  ;;  %v1840_v8 = vld [vmem:[#allocation2 + $0x138] sm:$0xff]  }
 0x1f5   : > { %1713 = vmatprep.subr.bf16.mxu0 %v1967_v2 }
 0x251   : > { %v596_v61 = vpop.permute.xlu0 %595 }
 0x2a7   : > { %v519_v52 = vpop.f32.mrf.mxu0 }
 0x2a8   : > { %v520_v53 = vadd.f32 %v519_v52, %v483_v51 }
 0x2a9   : > { %v1675_v54 = vpop.f32.mrf.mxu0 }
 0x2aa   : > { %v587_v55 = vadd.f32 %v582_v45, %v520_v53  ;;  %v1836_v45 = vld [vmem:[#allocation2 + $0xd8] sm:$0xff]  }
 0x2ab   : > { %v522_v56 = vpop.f32.mrf.mxu0 }
 0x2ac   : > { %v1523_v57 = vmul.f32 -1.442695, %v587_v55  ;;  %v1838_v56 = vld [vmem:[#allocation2 + $0xe8] sm:$0xff]  }
 0x2ad   : > { %v1676_v58 = vpop.f32.mrf.mxu0 }
 0x2ae   : > { %1864 = vpow2.f32 %v1523_v57  ;;  %v1839_v57 = vld [vmem:[#allocation2 + $0xe0] sm:$0xff]   ;;  %v1842_v58 = vld [vmem:[#allocation2 + $0x128] sm:$0xff]  }
 0x2bb   : > { %v1865_v59 = vpop.eup %1864 }
 0x2bc   : > { %v591_v60 = vadd.f32 1.0, %v1865_v59  ;;  %v1843_v59 = vld [vmem:[#allocation2 + $0x120] sm:$0xff]  }
 0x2be   : > { %1866 = vrcp.f32 %v591_v60  ;;  %v1844_v60 = vld [vmem:[#allocation2 + $0x118] sm:$0xff]  }
 0x2cb   : > { %v1867_v62 = vpop.eup %1866 }
 0x2cc   : > { %v598_v63 = vmul.f32 %v1867_v62, %v596_v61  ;;  %v605_v10 = vsub.f32 1.0, %v1867_v62  ;;  %v813_v61 = vrot.slane %v2074_v17, 6 }
 0x2ce   : > { %600 = vrot.lane.b32.xlu0 %v598_v63, %s1969_s14 }
 0x340   : > { %v601_v0 = vpop.permute.xlu0 %600 }
 0x341   : > { %v603_v1 = vadd.f32 %v601_v0, %v520_v53 }
 0x343   : > { %1868 = vtanh.f32 %v603_v1 }
 0x350   : > { %v1869_v5 = vpop.eup %1868 }
 0x351   : > { %607 = vrot.lane.b32.xlu1 %v1869_v5, %s1970_s15 }
 0x355   : > { %612 = vrot.lane.b32.xlu1 %v2079_v30, %s1971_s16 }
 0x359   : > { %622 = vrot.lane.b32.xlu1 %v621_v7, %s1971_s16 }
 0x3c3   : > { %v608_v9 = vpop.permute.xlu1 %607 }
 0x3c4   : > { %v610_v12 = vmul.f32 %v608_v9, %v605_v10  ;;  %v1841_v10 = vld [vmem:[#allocation2 + $0x130] sm:$0xff]  }
 0x3c7   : > { %v613_v11 = vpop.permute.xlu1 %612 }
 0x3c8   : > { %v615_v13 = vmul.f32 %v1867_v62, %v613_v11  ;;  %v1037_v11 = vrot.slane %v2084_v31, 1  ;;  %v1848_v31 = vld [vmem:[#allocation2 + $0xf8] sm:$0xff]  }
 0x3ca   : > { %v616_v14 = vadd.f32 %v615_v13, %v610_v12  ;;  %v1845_v12 = vld [vmem:[#allocation2 + $0x110] sm:$0xff]   ;;  %v1846_v13 = vld [vmem:[#allocation2 + $0x108] sm:$0xff]  }
 0x3cb   : > { %v623_v15 = vpop.permute.xlu1 %622 }
 0x3cc   : > { %618 = vrot.lane.b32.xlu0 %v616_v14, %s1970_s15  ;;  %v1847_v14 = vld [vmem:[#allocation2 + $0x100] sm:$0xff]  }
 0x43e   : > { %v2113_v16 = vpop.permute.xlu0 %618 }
 0x43f   : > { %v625_v18 = vsel %vm259_vm1, %v2113_v16, %v623_v15 }
 0x440   : > { %v634_v19 = vpack.c.bf16 %v625_v18, %v625_v18  ;;  %v881_v18 = vrot.slane %v2074_v17, 7 }
 0x442   : > { %1694 = vmatmul.mubr.msk.bf16.vlgmr.msra.gmra.mxu0 %vm661_vm2, %v634_v19 }
 0x443   : > { %1717 = vmatprep.mubr.msk.bf16.mxu0 %vm1968_vm0, %v1967_v2  ;;  %1714 = vmatpush3.bf16.msra.mxu0 %v1838_v56 }
 0x444   : > { %1715 = vmatprep.subr.bf16.mxu0 %v1967_v2 }
 0x447   : > { %1716 = vmatpush3.bf16.msra.mxu0 %v1839_v57 }
 0x448   : > { %1741 = vmatprep.subr.bf16.mxu0 %v1967_v2 }
 0x502   : > { %v699_v21 = vpop.f32.mrf.mxu0 }
 0x503   : > { %v700_v22 = vadd.f32 %v699_v21, %v659_v20 }
 0x504   : > { %v1695_v23 = vpop.f32.mrf.mxu0 }
 0x505   : > { %712 = vrot.lane.b32.xlu0 %v700_v22, %s1971_s16  ;;  %v1529_v26 = vmul.f32 -1.442695, %v700_v22 }
 0x506   : > { %v702_v24 = vpop.f32.mrf.mxu0 }
 0x507   : > { %1870 = vpow2.f32 %v1529_v26 }
 0x508   : > { %v1696_v25 = vpop.f32.mrf.mxu0 }
 0x514   : > { %v1871_v27 = vpop.eup %1870 }
 0x515   : > { %v708_v28 = vadd.f32 1.0, %v1871_v27 }
 0x517   : > { %1872 = vrcp.f32 %v708_v28 }
 0x524   : > { %v1873_v29 = vpop.eup %1872 }
 0x525   : > { %v722_v39 = vsub.f32 1.0, %v1873_v29  ;;  %v728_v41 = vmul.f32 %v1873_v29, %v623_v15  ;;  %v1849_v15 = vld [vmem:[#allocation2 + $0xf0] sm:$0xff]  }
 0x577   : > { %v713_v32 = vpop.permute.xlu0 %712 }
 0x578   : > { %v715_v33 = vmul.f32 %v1873_v29, %v713_v32 }
 0x57a   : > { %717 = vrot.lane.b32.xlu1 %v715_v33, %s1969_s14 }
 0x5ec   : > { %v718_v34 = vpop.permute.xlu1 %717 }
 0x5ed   : > { %v720_v35 = vadd.f32 %v718_v34, %v700_v22  ;;  %v2164_v22 = vld [vmem:[%s2233_s1 + $0x8] sm:$0xff] }
 0x5ee   : > { %v1051_v24 = vrot.slane %v2164_v22, 1 }
 0x5ef   : > { %1874 = vtanh.f32 %v720_v35 }
 0x5fc   : > { %v1875_v38 = vpop.eup %1874 }
 0x5fd   : > { %724 = vrot.lane.b32.xlu0 %v1875_v38, %s1970_s15 }
 0x66f   : > { %v725_v40 = vpop.permute.xlu0 %724 }
 0x670   : > { %v727_v42 = vmul.f32 %v725_v40, %v722_v39 }
 0x672   : > { %v2126_v43 = vadd.f32 %v728_v41, %v727_v42 }
 0x674   : > { %v734_v44 = vpack.c.bf16 %v2126_v43, %v2126_v43 }
 0x676   : > { %736 = vrot.lane.b32.xlu1 %v734_v44, %s1970_s15 }
 0x6e8   : > { %v737_v46 = vpop.permute.xlu1 %736 }
 0x6e9   : > { %1702 = vmatmul.mubr.msk.bf16.vlgmr.msra.gmra.mxu1 %vm259_vm1, %v737_v46 }
 0x6ea   : > { %1706 = vmatpush3.bf16.msra.mxu1 %v1836_v45  ;;  %1709 = vmatprep.mubr.msk.bf16.mxu1 %vm1968_vm0, %v1967_v2 }
 0x6eb   : > { %1707 = vmatprep.subr.bf16.mxu1 %v1967_v2 }
 0x6ee   : > { %1708 = vmatpush3.bf16.msra.mxu1 %v1837_v47  ;;  %v1120_v47 = vrot.slane %v2079_v30, 2 }
 0x6ef   : > { %1721 = vmatprep.subr.bf16.mxu1 %v1967_v2 }
 0x7a9   : > { %v789_v49 = vpop.f32.mrf.mxu1 }
 0x7aa   : > { %v790_v50 = vadd.f32 %v789_v49, %v750_v48 }
 0x7ab   : > { %v1703_v51 = vpop.f32.mrf.mxu1 }
 0x7ac   : > { %v795_v52 = vmax.f32 %v790_v50, 0.0  ;;  %v1130_v50 = vrot.slane %v2079_v30, 3  ;;  %v1850_v51 = vld [vmem:[#allocation2 + $0x158] sm:$0xff]  }
 0x7ad   : > { %v792_v53 = vpop.f32.mrf.mxu1 }
 0x7ae   : > { %v800_v54 = vpack.c.bf16 %v795_v52, %v795_v52  ;;  %v1851_v52 = vld [vmem:[#allocation2 + $0x150] sm:$0xff]   ;;  %v1852_v53 = vld [vmem:[#allocation2 + $0x148] sm:$0xff]  }
 0x7af   : > { %v1704_v55 = vpop.f32.mrf.mxu1 }
 0x7b0   : > { %1710 = vmatmul.mubr.msk.bf16.vlgmr.msra.gmra.mxu1 %vm259_vm1, %v800_v54  ;;  %v1853_v55 = vld [vmem:[#allocation2 + $0x140] sm:$0xff]  }
 0x7b1   : > { %1737 = vmatprep.mubr.msk.bf16.mxu1 %vm1968_vm0, %v1967_v2  ;;  %1722 = vmatpush3.bf16.msra.mxu1 %v1842_v58 }
 0x7b2   : > { %1723 = vmatprep.subr.bf16.mxu1 %v1967_v2 }
 0x7b5   : > { %1724 = vmatpush3.bf16.msra.mxu1 %v1843_v59 }
 0x7b6   : > { %1725 = vmatprep.subr.bf16.mxu1 %v1967_v2 }
 0x7b9   : > { %1726 = vmatpush3.bf16.msra.mxu1 %v1844_v60 }
 0x7ba   : > { %1727 = vmatprep.subr.bf16.mxu1 %v1967_v2 }
 0x7bd   : > { %1728 = vmatpush3.bf16.msra.mxu1 %v1845_v12 }
 0x7be   : > { %1729 = vmatprep.subr.bf16.mxu1 %v1967_v2 }
 0x7c1   : > { %1730 = vmatpush3.bf16.msra.mxu1 %v1846_v13 }
 0x7c2   : > { %1731 = vmatprep.subr.bf16.mxu1 %v1967_v2 }
 0x7c5   : > { %1732 = vmatpush3.bf16.msra.mxu1 %v1847_v14 }
 0x7c6   : > { %1733 = vmatprep.subr.bf16.mxu1 %v1967_v2 }
 0x7c9   : > { %1734 = vmatpush3.bf16.msra.mxu1 %v1848_v31 }
 0x7ca   : > { %1735 = vmatprep.subr.bf16.mxu1 %v1967_v2 }
 0x7cd   : > { %1736 = vmatpush3.bf16.msra.mxu1 %v1849_v15  ;;  %v1854_v15 = vld [vmem:[#allocation2 + $0x168] sm:$0xff]  }
 0x7ce   : > { %1769 = vmatprep.subr.bf16.mxu1 %v1967_v2 }
 0x870   : > { %v852_v62 = vpop.f32.mrf.mxu1 }
 0x871   : > { %v853_v63 = vadd.f32 %v852_v62, %v813_v61 }
 0x872   : > { %v1711_v0 = vpop.f32.mrf.mxu1 }
 0x873   : > { %v1536_v1 = vmul.f32 -1.442695, %v853_v63 }
 0x874   : > { %v855_v3 = vpop.f32.mrf.mxu1 }
 0x875   : > { %1876 = vpow2.f32 %v1536_v1  ;;  %v1168_v1 = vrot.slane %v2164_v22, 2 }
 0x876   : > { %v1712_v4 = vpop.f32.mrf.mxu1 }
 0x882   : > { %v1877_v5 = vpop.eup %1876 }
 0x883   : > { %v861_v6 = vadd.f32 1.0, %v1877_v5 }
 0x885   : > { %1878 = vrcp.f32 %v861_v6 }
 0x892   : > { %v1879_v7 = vpop.eup %1878 }
 0x893   : > { %v868_v9 = vpack.c.bf16 %v1879_v7, %v1879_v7 }
 0x895   : > { %1718 = vmatmul.mubr.msk.bf16.vlgmr.msra.gmra.mxu0 %vm259_vm1, %v868_v9 }
 0x896   : > { %1742 = vmatpush3.bf16.msra.mxu0 %v1840_v8  ;;  %1745 = vmatprep.mubr.msk.bf16.mxu0 %vm1968_vm0, %v1967_v2 }
 0x897   : > { %1743 = vmatprep.subr.bf16.mxu0 %v1967_v2 }
 0x89a   : > { %1744 = vmatpush3.bf16.msra.mxu0 %v1841_v10 }
 0x89b   : > { %1749 = vmatprep.subr.bf16.mxu0 %v1967_v2 }
 0x89d   : > { %1746 = vmatmul.mubr.msk.bf16.vlgmr.msra.gmra.mxu0 %vm259_vm1, %v1037_v11 }
 0x89e   : > { %1757 = vmatprep.mubr.msk.bf16.mxu0 %vm1968_vm0, %v1967_v2  ;;  %1750 = vmatpush3.bf16.msra.mxu0 %v1850_v51 }
 0x89f   : > { %1751 = vmatprep.subr.bf16.mxu0 %v1967_v2 }
 0x8a2   : > { %1752 = vmatpush3.bf16.msra.mxu0 %v1851_v52 }
 0x8a3   : > { %1753 = vmatprep.subr.bf16.mxu0 %v1967_v2 }
 0x8a6   : > { %1754 = vmatpush3.bf16.msra.mxu0 %v1852_v53 }
 0x8a7   : > { %1755 = vmatprep.subr.bf16.mxu0 %v1967_v2 }
 0x8aa   : > { %1756 = vmatpush3.bf16.msra.mxu0 %v1853_v55 }
 0x8ab   : > { %1761 = vmatprep.subr.bf16.mxu0 %v1967_v2 }
 0x955   : > { %v920_v19 = vpop.f32.mrf.mxu0 }
 0x956   : > { %v921_v20 = vadd.f32 %v920_v19, %v881_v18  ;;  %v1855_v18 = vld [vmem:[#allocation2 + $0x160] sm:$0xff]  }
 0x957   : > { %v1719_v21 = vpop.f32.mrf.mxu0 }
 0x958   : > { %1880 = vtanh.f32 %v921_v20  ;;  %v1856_v20 = vld [vmem:[#allocation2 + $0x178] sm:$0xff]  }
 0x959   : > { %v923_v23 = vpop.f32.mrf.mxu0 }
 0x95b   : > { %v1720_v25 = vpop.f32.mrf.mxu0 }
 0x95d   : > { %v1090_v26 = vpop.f32.mrf.mxu0 }
 0x95e   : > { %v1091_v27 = vadd.f32 %v1090_v26, %v1051_v24 }
 0x95f   : > { %v1747_v28 = vpop.f32.mrf.mxu0 }
 0x960   : > { %1104 = vrot.lane.b32.xlu0 %v1091_v27, %s1969_s14 }
 0x961   : > { %v1093_v29 = vpop.f32.mrf.mxu0 }
 0x962   : > { %v1857_v29 = vld [vmem:[#allocation2 + $0x170] sm:$0xff]  }
 0x963   : > { %v1748_v17 = vpop.f32.mrf.mxu0 }
 0x964   : > { %v1258_v17 = vrot.slane %v2164_v22, 3 }
 0x965   : > { %v1881_v32 = vpop.eup %1880 }
 0x966   : > { %v943_v33 = vpack.c.bf16 %v1881_v32, %v1881_v32 }
 0x968   : > { %1738 = vmatmul.mubr.bf16.vlgmr.msra.gmra.mxu1 %v943_v33 }
 0x969   : > { %1773 = vmatprep.mubr.msk.bf16.mxu1 %vm1968_vm0, %v1967_v2  ;;  %1770 = vmatpush3.bf16.msra.mxu1 %v1856_v20 }
 0x96a   : > { %1771 = vmatprep.subr.bf16.mxu1 %v1967_v2 }
 0x96d   : > { %1772 = vmatpush3.bf16.msra.mxu1 %v1857_v29 }
 0x9d2   : > { %v1105_v44 = vpop.permute.xlu0 %1104 }
 0xa28   : > { %v1026_v34 = vpop.f32.mrf.mxu1 }
 0xa29   : > { %v1027_v35 = vadd.f32 %v1026_v34, %v2164_v22 }
 0xa2a   : > { %v1739_v36 = vpop.f32.mrf.mxu1 }
 0xa2b   : > { %v1096_v37 = vadd.f32 %v1091_v27, %v1027_v35 }
 0xa2c   : > { %v1029_v38 = vpop.f32.mrf.mxu1 }
 0xa2d   : > { %v1551_v39 = vmul.f32 -1.442695, %v1096_v37  ;;  %v238_v38 = vlaneseq }
 0xa2e   : > { %v1740_v40 = vpop.f32.mrf.mxu1 }
 0xa2f   : > { %1882 = vpow2.f32 %v1551_v39  ;;  %v239_v39 = vand.u32 127, %v238_v38  ;;  %v1321_v40 = vrot.slane %v2164_v22, 4 }
 0xa31   : > { %vm1366_vm3 = vcmp.lt.s32.totalorder %v239_v39, 3 }
 0xa3c   : > { %v1883_v41 = vpop.eup %1882 }
 0xa3d   : > { %v1100_v42 = vadd.f32 1.0, %v1883_v41 }
 0xa3f   : > { %1884 = vrcp.f32 %v1100_v42 }
 0xa4c   : > { %v1885_v45 = vpop.eup %1884 }
 0xa4d   : > { %v1107_v46 = vmul.f32 %v1885_v45, %v1105_v44  ;;  %v1114_v56 = vsub.f32 1.0, %v1885_v45 }
 0xa4f   : > { %1109 = vrot.lane.b32.xlu1 %v1107_v46, %s1969_s14 }
 0xa53   : > { %1121 = vrot.lane.b32.xlu1 %v1120_v47, %s1971_s16 }
 0xa57   : > { %1131 = vrot.lane.b32.xlu1 %v1130_v50, %s1971_s16 }
 0xac1   : > { %v1110_v48 = vpop.permute.xlu1 %1109 }
 0xac2   : > { %v1112_v49 = vadd.f32 %v1110_v48, %v1027_v35 }
 0xac4   : > { %1886 = vtanh.f32 %v1112_v49 }
 0xac5   : > { %v1122_v30 = vpop.permute.xlu1 %1121 }
 0xac6   : > { %v1124_v58 = vmul.f32 %v1885_v45, %v1122_v30 }
 0xac9   : > { %v1132_v61 = vpop.permute.xlu1 %1131 }
 0xad1   : > { %v1887_v54 = vpop.eup %1886 }
 0xad2   : > { %1116 = vrot.lane.b32.xlu0 %v1887_v54, %s1970_s15 }
 0xb44   : > { %v1117_v57 = vpop.permute.xlu0 %1116 }
 0xb45   : > { %v1119_v59 = vmul.f32 %v1117_v57, %v1114_v56  ;;  %v1383_v56 = vsel %vm259_vm1, %v2113_v16, 0.0 }
 0xb47   : > { %v1125_v60 = vadd.f32 %v1124_v58, %v1119_v59 }
 0xb49   : > { %1127 = vrot.lane.b32.xlu0 %v1125_v60, %s1970_s15 }
 0xbbb   : > { %v2182_v62 = vpop.permute.xlu0 %1127 }
 0xbbc   : > { %v1134_v63 = vsel %vm259_vm1, %v2182_v62, %v1132_v61 }
 0xbbd   : > { %v1143_v0 = vpack.c.bf16 %v1134_v63, %v1134_v63 }
 0xbbf   : > { %1758 = vmatmul.mubr.msk.bf16.vlgmr.msra.gmra.mxu0 %vm661_vm2, %v1143_v0 }
 0xbc0   : > { %1765 = vmatprep.mubr.msk.bf16.mxu0 %vm1968_vm0, %v1967_v2  ;;  %1762 = vmatpush3.bf16.msra.mxu0 %v1854_v15 }
 0xbc1   : > { %1763 = vmatprep.subr.bf16.mxu0 %v1967_v2 }
 0xbc4   : > { %1764 = vmatpush3.bf16.msra.mxu0 %v1855_v18 }
 0xc7f   : > { %v1207_v3 = vpop.f32.mrf.mxu0 }
 0xc80   : > { %v1208_v4 = vadd.f32 %v1207_v3, %v1168_v1 }
 0xc81   : > { %v1759_v5 = vpop.f32.mrf.mxu0 }
 0xc82   : > { %1220 = vrot.lane.b32.xlu0 %v1208_v4, %s1971_s16  ;;  %v1557_v8 = vmul.f32 -1.442695, %v1208_v4 }
 0xc83   : > { %v1210_v6 = vpop.f32.mrf.mxu0 }
 0xc84   : > { %1888 = vpow2.f32 %v1557_v8 }
 0xc85   : > { %v1760_v7 = vpop.f32.mrf.mxu0 }
 0xc91   : > { %v1889_v9 = vpop.eup %1888 }
 0xc92   : > { %v1216_v10 = vadd.f32 1.0, %v1889_v9 }
 0xc94   : > { %1890 = vrcp.f32 %v1216_v10 }
 0xca1   : > { %v1891_v11 = vpop.eup %1890 }
 0xca2   : > { %v1230_v21 = vsub.f32 1.0, %v1891_v11  ;;  %v1236_v24 = vmul.f32 %v1891_v11, %v1132_v61 }
 0xcf4   : > { %v1221_v12 = vpop.permute.xlu0 %1220 }
 0xcf5   : > { %v1223_v13 = vmul.f32 %v1891_v11, %v1221_v12 }
 0xcf7   : > { %1225 = vrot.lane.b32.xlu1 %v1223_v13, %s1969_s14 }
 0xd69   : > { %v1226_v14 = vpop.permute.xlu1 %1225 }
 0xd6a   : > { %v1228_v31 = vadd.f32 %v1226_v14, %v1208_v4 }
 0xd6c   : > { %1892 = vtanh.f32 %v1228_v31 }
 0xd79   : > { %v1893_v19 = vpop.eup %1892 }
 0xd7a   : > { %1232 = vrot.lane.b32.xlu0 %v1893_v19, %s1970_s15 }
 0xdec   : > { %v1233_v23 = vpop.permute.xlu0 %1232 }
 0xded   : > { %v1235_v25 = vmul.f32 %v1233_v23, %v1230_v21 }
 0xdef   : > { %v1237_v26 = vadd.f32 %v1236_v24, %v1235_v25 }
 0xdf1   : > { %v1242_v27 = vpack.c.bf16 %v1237_v26, %v1237_v26 }
 0xdf3   : > { %1244 = vrot.lane.b32.xlu1 %v1242_v27, %s1970_s15 }
 0xe65   : > { %v1245_v28 = vpop.permute.xlu1 %1244 }
 0xe66   : > { %1766 = vmatmul.mubr.msk.bf16.vlgmr.msra.gmra.mxu0 %vm259_vm1, %v1245_v28 }
 0xf26   : > { %v1297_v32 = vpop.f32.mrf.mxu0 }
 0xf27   : > { %v1298_v33 = vadd.f32 %v1297_v32, %v1258_v17 }
 0xf28   : > { %v1767_v34 = vpop.f32.mrf.mxu0 }
 0xf29   : > { %v1303_v35 = vmax.f32 %v1298_v33, 0.0 }
 0xf2a   : > { %v1300_v2 = vpop.f32.mrf.mxu0 }
 0xf2b   : > { %v1308_v36 = vpack.c.bf16 %v1303_v35, %v1303_v35 }
 0xf2c   : > { %v1768_v37 = vpop.f32.mrf.mxu0 }
 0xf2d   : > { %1774 = vmatmul.mubr.msk.bf16.vlgmr.msra.gmra.mxu1 %vm259_vm1, %v1308_v36 }
 0xfed   : > { %v1360_v41 = vpop.f32.mrf.mxu1 }
 0xfee   : > { %v1361_v42 = vadd.f32 %v1360_v41, %v1321_v40 }
 0xfef   : > { %v1775_v44 = vpop.f32.mrf.mxu1 }
 0xff0   : > { %v1367_v45 = vsel %vm1366_vm3, %v1361_v42, -inf }
 0xff1   : > { %v1363_v46 = vpop.f32.mrf.mxu1  ;;  %v1369_v47 = vsel %vm1368_vm4, %v1367_v45, -inf }
 0xff2   : > { %1370 = vmax.xlane.f32.xlu0 %v1369_v47 }
 0xff3   : > { %v1776_v48 = vpop.f32.mrf.mxu1 }
0x1008   : > { %1385 = vrot.lane.b32.xlu0 %v2126_v43, %s1970_s15  ;;  %v1389_v43 = vsel %vm259_vm1, %v2182_v62, 0.0 }
0x1009   : > { %v1399_v59 = vrot.slane %v1389_v43, 6 }
0x107b   : > { %v1371_v49 = vpop.xlane.xlu0 %1370 }
0x107c   : > { %v1372_v50 = vsub.f32 %v1367_v45, %v1371_v49 }
0x107e   : > { %v1373_v51 = vmul.f32 1.442695, %v1372_v50 }
0x107f   : > { %v1386_v53 = vpop.permute.xlu0 %1385 }
0x1080   : > { %1894 = vpow2.f32 %v1373_v51  ;;  %v1388_v54 = vsel %vm259_vm1, %v1386_v53, 0.0 }
0x1081   : > { %v1396_v55 = vrot.slane %v1388_v54, 7 }
0x1083   : > { %v1404_v57 = vsel %vm1368_vm4, %v1383_v56, %v1396_v55 }
0x1084   : > { %v1406_v63 = vsel %vm1405_vm5, %v1404_v57, %v1399_v59 }
0x108d   : > { %v1895_v52 = vpop.eup %1894 }
0x108e   : > { %v1375_v22 = vsel %vm1368_vm4, %v1895_v52, 0.0 }
0x108f   : > { %1376 = vadd.xlane.f32.xlu1 %v1375_v22 }
0x10a0   : > { %1391 = vrot.lane.b32.xlu1 %v1237_v26, %s1970_s15 }
0x1118   : > { %v1377_v30 = vpop.xlane.xlu1 %1376 }
0x1119   : > { %1896 = vrcp.f32 %v1377_v30 }
0x111c   : > { %v1392_v58 = vpop.permute.xlu1 %1391 }
0x111d   : > { %v1394_v60 = vsel %vm259_vm1, %v1392_v58, 0.0 }
0x111e   : > { %v1402_v61 = vrot.slane %v1394_v60, 5 }
0x1120   : > { %v1408_v0 = vsel %vm1407_vm6, %v1406_v63, %v1402_v61 }
0x1121   : > { %v1410_v62 = vsel %vm1409_vm7, %v1408_v0, 0.0 }
0x1122   : > { %1411 = vst [vmem:[#allocation5] sm:$0xff] %v1410_v62 }
0x1123   : > { %1937 = shalt.err (!%p1934_p9)
}
0x1124   : > { %1782 = dma.vmem_to_hbm [thread:$0]  (%p1791_p2), %s1426_s22, 128, %s2237_s5, [#allocation4]   ;;  %vm1380_vm8 = vcmp.eq.s32.totalorder %v239_v39, 3 }
0x1126   : > { %v1897_v16 = vpop.eup %1896 }
0x1127   : > { %v1379_v1 = vmul.f32 %v1897_v16, %v1895_v52 }
0x1129   : > { %v1381_v3 = vsel %vm1380_vm8, %v1361_v42, %v1379_v1 }
0x112a   : > { %1382 = vst [vmem:[%s228_s9] sm:$0x1] %v1381_v3 }
0x112b   : > { %1957 = dma.done.wait (%p1791_p2), [#allocation4], 128  }
0x112c   : > { %1959 = vsyncadd (%p1791_p2), [#allocation4], 4294967168 }
0x112d PF: > { %s18_s18 = sadd.s32 1, %s1962_s18  }
0x112e   : > { %p15_p10 = scmp.ge.s32.totalorder %s18_s18, 7  }
0x1130   :  { %17 = sbr.rel (!%p15_p10) target bundleno = 2 (0x2), region = 84 }
0x1135   :  { %1444 = vsyncpa [#allocation3], 1 }
0x1136   :  { %1446 = vsyncpa [#allocation3 + $0x1], 1 }
0x1137   :  { %1447 = vsyncpa [#allocation4], 1 }
0x1138   :  { %1449 = vsyncpa [#allocation4 + $0x1], 1 }

</bundles_post_ra>
